<compile_context>
chip_gen: v7x
topology: tpu7x:2x2x1
jax: 0.10.0
libtpu: 0.0.40
codegen_flags: <defaults>
</compile_context>

<pallas_src>
import functools

import numpy as np
import jax
import jax.numpy as jnp
from jax.experimental import pallas as pl
from jax.experimental.pallas import tpu as pltpu


def _ccl_kernel(x_ref, out_ref, *, margin):
    """x_ref: (c_blk, 2, S, D) native dtype; out_ref: (1, c_blk, 1) f32."""
    x = x_ref[...]
    pos = x[:, 0].astype(jnp.float32)                     # (c_blk, S, D)
    neg = x[:, 1].astype(jnp.float32)                     # (c_blk, S, D)

    # Anchor per class = mean of positives over the sample axis (no padding ->
    # exact, no masking needed).
    anchor = jnp.mean(pos, axis=1, keepdims=True)         # (c_blk, 1, D)

    dp = pos - anchor
    ap_sq = jnp.sum(dp * dp, axis=2)                      # (c_blk, S)
    dn = neg - anchor
    an_sq = jnp.sum(dn * dn, axis=2)                      # (c_blk, S)

    # Hardest negative distance per class: sqrt(min sq-dist) == dist[argmin].
    an = jnp.sqrt(jnp.min(an_sq, axis=1, keepdims=True))  # (c_blk, 1)
    ap = jnp.sqrt(ap_sq)                                  # (c_blk, S)

    hinge = jnp.maximum(ap - an + margin, 0.0)
    loss = jnp.sum(hinge * hinge, axis=1, keepdims=True)  # (c_blk, 1)
    out_ref[...] = loss[None]                             # (1, c_blk, 1)


def _pick_c_blk(n_classes, per_class_bytes_f32):
    """Largest divisor of n_classes giving ~2 MiB (at most ~4 MiB) f32 blocks."""
    target = 2 << 20
    hard_max = 4 << 20
    divisors = [c for c in range(1, n_classes + 1) if n_classes % c == 0]
    fits_target = [c for c in divisors if c * per_class_bytes_f32 <= target] or [1]
    best = max(fits_target)
    if best * per_class_bytes_f32 < (256 << 10):
        # Still a tiny block (e.g. prime n_classes) -> allow up to hard_max.
        fits_max = [c for c in divisors if c * per_class_bytes_f32 <= hard_max]
        if fits_max:
            best = max(best, max(fits_max))
    return best


@functools.partial(jax.jit, static_argnames=("margin", "n_classes", "n_samples"))
def coupled_clusters_loss(embeddings, *, margin, n_classes, n_samples):
    n, d = embeddings.shape
    assert n == 2 * n_classes * n_samples, "embeddings rows != 2*n_classes*n_samples"

    # Keep f32 / bf16 as-is (bf16 is cast to f32 *inside* the kernel so HBM
    # reads stay half-width); anything else is promoted to f32.
    if embeddings.dtype != jnp.float32 and embeddings.dtype != jnp.bfloat16:
        embeddings = embeddings.astype(jnp.float32)

    # Pure reshape (row-major, no copy, no pad): (class, pos/neg, sample, dim)
    # matches the reference's row slicing exactly.
    x = embeddings.reshape(n_classes, 2, n_samples, d)

    per_class_bytes_nat = 2 * n_samples * d * embeddings.dtype.itemsize
    per_class_bytes_f32 = 2 * n_samples * d * 4
    c_blk = _pick_c_blk(n_classes, per_class_bytes_f32)
    n_blocks = n_classes // c_blk

    # VMEM budget: double-buffered native input block + ~4x f32 intermediates
    # (casted pos/neg, diffs, squares) + headroom; capped for v7x (64 MiB VMEM).
    vmem_need = (2 * c_blk * per_class_bytes_nat
                 + 4 * c_blk * per_class_bytes_f32
                 + (2 << 20))
    vmem_bytes = int(min(max(vmem_need, 8 << 20), 32 << 20))

    out = pl.pallas_call(
        functools.partial(_ccl_kernel, margin=float(margin)),
        out_shape=jax.ShapeDtypeStruct((n_blocks, c_blk, 1), jnp.float32),
        grid=(n_blocks,),
        in_specs=[pl.BlockSpec((c_blk, 2, n_samples, d), lambda i: (i, 0, 0, 0))],
        out_specs=pl.BlockSpec((1, c_blk, 1), lambda i: (i, 0, 0)),
        compiler_params=pltpu.CompilerParams(
            # Class blocks are fully independent -> megacore-shardable on v7x.
            dimension_semantics=("parallel",),
            vmem_limit_bytes=vmem_bytes),
    )(x)

    losses = out.reshape(n_classes)          # per-class losses, like the reference
    return jnp.mean(losses)


class CoupledClustersLossV2:
    def __init__(self, margin, n_classes, n_samples):
        self.margin = float(margin)
        self.n_classes = int(n_classes)
        self.n_samples = int(n_samples)

    def forward(self, embeddings, target):
        # `target` is unused by the reference forward as well.
        del target
        return coupled_clusters_loss(embeddings, margin=self.margin,
                                     n_classes=self.n_classes,
                                     n_samples=self.n_samples)

    __call__ = forward


def _ref_loss(emb_f32, margin, n_classes, n_samples):
    """Pure-NumPy reference mirroring the PyTorch forward exactly."""
    losses = []
    for i in range(n_classes):
        pos = emb_f32[2 * i * n_samples:(2 * i + 1) * n_samples]
        neg = emb_f32[(2 * i + 1) * n_samples:(2 * i + 2) * n_samples]
        anchor = pos.mean(axis=0, keepdims=True)
        nad = ((neg - anchor) ** 2).sum(1)
        ap = np.sqrt(((anchor - pos) ** 2).sum(1))
        an = np.sqrt(((anchor[0] - neg[nad.argmin()]) ** 2).sum())
        losses.append((np.maximum(ap - an + margin, 0.0) ** 2).sum())
    return float(np.mean(np.asarray(losses, dtype=np.float32)))


if __name__ == "__main__":
    def run_case(name, key, n_classes, n_samples, d, margin, scale, dtype, tol):
        n = 2 * n_classes * n_samples
        emb = scale * jax.random.normal(key, (n, d), dtype=jnp.float32)
        emb = emb.astype(dtype)
        target = jnp.zeros((n,), dtype=jnp.int32)   # unused, as in the reference
        module = CoupledClustersLossV2(margin, n_classes, n_samples)
        loss = jax.block_until_ready(module(emb, target))
        ref = _ref_loss(np.asarray(emb).astype(np.float32), margin,
                        n_classes, n_samples)
        err = abs(float(loss) - ref)
        assert err <= tol * max(1.0, abs(ref)), (name, float(loss), ref)

    key = jax.random.PRNGKey(0)
    k1, k2, k3 = jax.random.split(key, 3)

    # 1) Small, non-(8,128)-aligned shapes (full-dim blocks, single grid step).
    run_case("small_unaligned_f32", k1, n_classes=4, n_samples=5, d=40,
             margin=2.0, scale=1.0, dtype=jnp.float32, tol=1e-4)
    # 2) Larger D -> multiple class blocks (exercises the batched grid path).
    run_case("multiblock_f32", k2, n_classes=16, n_samples=8, d=4096,
             margin=1.0, scale=0.01, dtype=jnp.float32, tol=5e-4)
    # 3) bf16 ingest: DMA bf16, cast to f32 inside the kernel.
    run_case("bf16_ingest", k3, n_classes=6, n_samples=8, d=256,
             margin=1.0, scale=0.05, dtype=jnp.bfloat16, tol=1e-2)

    print("KERNEL_OK")
</pallas_src>

<mosaic_0001>
module attributes {stable_mosaic.version = 11 : i64} {
  func.func @_ccl_kernel(%arg0: i32, %arg1: memref<4x2x5x40xf32, #tpu.memory_space<vmem>>, %arg2: memref<1x4x1xf32, #tpu.memory_space<vmem>>) attributes {dimension_semantics = [#tpu.dimension_semantics<parallel>], iteration_bounds = array<i64: 1>, scalar_prefetch = 0 : i64, scratch_operands = 0 : i64, tpu.core_type = #tpu.core_type<tc>, window_params = [{transform_indices = @transform_0, window_bounds = array<i64: 4, 2, 5, 40>}, {transform_indices = @transform_1, window_bounds = array<i64: 1, 4, 1>}]} {
    %c0 = arith.constant 0 : index
    %c0_0 = arith.constant 0 : index
    %c0_1 = arith.constant 0 : index
    %c0_2 = arith.constant 0 : index
    %0 = vector.load %arg1[%c0, %c0_0, %c0_1, %c0_2] : memref<4x2x5x40xf32, #tpu.memory_space<vmem>>, vector<4x2x5x40xf32>
    %1 = vector.extract_strided_slice %0 {offsets = [0, 0, 0, 0], sizes = [4, 1, 5, 40], strides = [1, 1, 1, 1]} : vector<4x2x5x40xf32> to vector<4x1x5x40xf32>
    %2 = vector.shape_cast %1 : vector<4x1x5x40xf32> to vector<4x5x40xf32>
    %3 = vector.extract_strided_slice %0 {offsets = [0, 1, 0, 0], sizes = [4, 1, 5, 40], strides = [1, 1, 1, 1]} : vector<4x2x5x40xf32> to vector<4x1x5x40xf32>
    %4 = vector.shape_cast %3 : vector<4x1x5x40xf32> to vector<4x5x40xf32>
    %cst = arith.constant dense<0.000000e+00> : vector<4x40xf32>
    %5 = vector.multi_reduction <add>, %2, %cst [1] : vector<4x5x40xf32> to vector<4x40xf32>
    %6 = vector.shape_cast %5 : vector<4x40xf32> to vector<4x1x40xf32>
    %cst_3 = arith.constant 5.000000e+00 : f32
    %7 = vector.broadcast %cst_3 : f32 to vector<4x1x40xf32>
    %8 = arith.divf %6, %7 : vector<4x1x40xf32>
    %9 = vector.broadcast %8 : vector<4x1x40xf32> to vector<4x5x40xf32>
    %10 = arith.subf %2, %9 : vector<4x5x40xf32>
    %11 = arith.mulf %10, %10 : vector<4x5x40xf32>
    %cst_4 = arith.constant dense<0.000000e+00> : vector<4x5xf32>
    %12 = vector.multi_reduction <add>, %11, %cst_4 [2] : vector<4x5x40xf32> to vector<4x5xf32>
    %13 = vector.broadcast %8 : vector<4x1x40xf32> to vector<4x5x40xf32>
    %14 = arith.subf %4, %13 : vector<4x5x40xf32>
    %15 = arith.mulf %14, %14 : vector<4x5x40xf32>
    %cst_5 = arith.constant dense<0.000000e+00> : vector<4x5xf32>
    %16 = vector.multi_reduction <add>, %15, %cst_5 [2] : vector<4x5x40xf32> to vector<4x5xf32>
    %cst_6 = arith.constant dense<0x7F800000> : vector<4xf32>
    %17 = vector.multi_reduction <minimumf>, %16, %cst_6 [1] : vector<4x5xf32> to vector<4xf32>
    %18 = vector.shape_cast %17 : vector<4xf32> to vector<4x1xf32>
    %19 = math.sqrt %18 : vector<4x1xf32>
    %20 = math.sqrt %12 : vector<4x5xf32>
    %21 = vector.broadcast %19 : vector<4x1xf32> to vector<4x5xf32>
    %22 = arith.subf %20, %21 : vector<4x5xf32>
    %cst_7 = arith.constant 2.000000e+00 : f32
    %23 = vector.broadcast %cst_7 : f32 to vector<4x5xf32>
    %24 = arith.addf %22, %23 : vector<4x5xf32>
    %cst_8 = arith.constant 0.000000e+00 : f32
    %25 = vector.broadcast %cst_8 : f32 to vector<4x5xf32>
    %26 = arith.maximumf %24, %25 : vector<4x5xf32>
    %27 = arith.mulf %26, %26 : vector<4x5xf32>
    %cst_9 = arith.constant dense<0.000000e+00> : vector<4xf32>
    %28 = vector.multi_reduction <add>, %27, %cst_9 [1] : vector<4x5xf32> to vector<4xf32>
    %29 = vector.shape_cast %28 : vector<4xf32> to vector<4x1xf32>
    %30 = vector.shape_cast %29 : vector<4x1xf32> to vector<1x4x1xf32>
    %c0_10 = arith.constant 0 : index
    %c0_11 = arith.constant 0 : index
    %c0_12 = arith.constant 0 : index
    %31 = vector.load %arg2[%c0_10, %c0_11, %c0_12] : memref<1x4x1xf32, #tpu.memory_space<vmem>>, vector<1x4x1xf32>
    tpu.vector_store %arg2[%c0_10, %c0_11, %c0_12], %30 {strides = array<i32>} : memref<1x4x1xf32, #tpu.memory_space<vmem>>, vector<1x4x1xf32>,
    return
  }
  func.func @transform_0(%arg0: i32) -> (i32, i32, i32, i32) {
    %c0_i32 = arith.constant 0 : i32
    %c0_i32_0 = arith.constant 0 : i32
    %c0_i32_1 = arith.constant 0 : i32
    %c0_i32_2 = arith.constant 0 : i32
    return %arg0, %c0_i32, %c0_i32_0, %c0_i32_1 : i32, i32, i32, i32
  }
  func.func @transform_1(%arg0: i32) -> (i32, i32, i32) {
    %c0_i32 = arith.constant 0 : i32
    %c0_i32_0 = arith.constant 0 : i32
    %c0_i32_1 = arith.constant 0 : i32
    return %arg0, %c0_i32, %c0_i32_0 : i32, i32, i32
  }
}

</mosaic_0001>

<bundles_post_ra>
// kernel: coupled_clusters_loss.1
= control target key start
LH: loop header
LB: loop body
LE: loop exit
PB: predicated region body
PF: predicated region fallthrough
CT: control target
= control target key end

     0   :  { %vm16_vm0 = vcmask 323584   ;;  %vm112_vm1 = vcmask 1041409   ;;  %vm114_vm2 = vcmask 1042434   ;;  %vm116_vm3 = vcmask 1043459   ;;  %s330_s0 = inlined_call_operand.vmem [shape: f32[4,2,5,40], index: 0, kind: input, shape index: {}]   ;;  %s331_s1 = inlined_call_operand.vmem [shape: f32[1,4,1], index: 1, kind: output, shape index: {}]  }
   0x1   :  { %v8_v0 = vld [vmem:[%s330_s0] sm:$0x1f]  ;;  %v10_v4 = vld [vmem:[%s330_s0 + $0x10] sm:$0x1f]  ;;  %v9_v29 = vld [vmem:[%s330_s0 + $0x8] sm:$0x1f] }
   0x2   :  { %v12_v1 = vld [vmem:[%s330_s0 + $0x20] sm:$0x1f]  ;;  %v17_v2 = vsel %vm16_vm0, %v8_v0, 0.0  ;;  %v24_v7 = vsel %vm16_vm0, %v10_v4, 0.0  ;;  %v14_v9 = vld [vmem:[%s330_s0 + $0x30] sm:$0x1f] }
   0x3   :  { %v31_v3 = vsel %vm16_vm0, %v12_v1, 0.0  ;;  %v18_v5 = vrot.slane %v17_v2, 4  ;;  %v25_v8 = vrot.slane %v24_v7, 4  ;;  %v38_v12 = vsel %vm16_vm0, %v14_v9, 0.0  ;;  %v13_v30 = vld [vmem:[%s330_s0 + $0x28] sm:$0x1f] }
   0x4   :  { %v32_v6 = vrot.slane %v31_v3, 4  ;;  %v39_v14 = vrot.slane %v38_v12, 4  ;;  %v11_v35 = vld [vmem:[%s330_s0 + $0x18] sm:$0x1f]  ;;  %vm119_vm4 = vcmask 35840   ;;  %vm234_vm15 = vcmask 3072  }
   0x5   :  { %v19_v10 = vadd.f32 %v18_v5, %v17_v2  ;;  %v26_v13 = vadd.f32 %v25_v8, %v24_v7  ;;  %v15_v40 = vld [vmem:[%s330_s0 + $0x38] sm:$0x1f]  ;;  %v94_v2 = vlaneseq }
   0x6   :  { %v33_v11 = vadd.f32 %v32_v6, %v31_v3  ;;  %v40_v18 = vadd.f32 %v39_v14, %v38_v12 }
   0x7   :  { %v20_v15 = vrot.slane %v19_v10, 2  ;;  %v27_v17 = vrot.slane %v26_v13, 2  ;;  %v95_v3 = vand.u32 127, %v94_v2 }
   0x8   :  { %v34_v16 = vrot.slane %v33_v11, 2  ;;  %v41_v22 = vrot.slane %v40_v18, 2 }
   0x9   :  { %v21_v19 = vadd.f32 %v20_v15, %v19_v10  ;;  %v28_v21 = vadd.f32 %v27_v17, %v26_v13 }
   0xa   :  { %v35_v20 = vadd.f32 %v34_v16, %v33_v11  ;;  %v42_v26 = vadd.f32 %v41_v22, %v40_v18  ;;  %v253_v16 = vmov 0  }
   0xb   :  { %v22_v23 = vrot.slane %v21_v19, 1  ;;  %v29_v25 = vrot.slane %v28_v21, 1  ;;  %242 = vset.pattern.permute.xlu0 %v253_v16  ;;  %241 = vset.pattern.permute.xlu1 %v253_v16 }
   0xc   :  { %v36_v24 = vrot.slane %v35_v20, 1  ;;  %v43_v32 = vrot.slane %v42_v26, 1 }
   0xd   :  { %v23_v27 = vadd.f32 %v22_v23, %v21_v19  ;;  %v30_v31 = vadd.f32 %v29_v25, %v28_v21 }
   0xe   :  { %v37_v28 = vadd.f32 %v36_v24, %v35_v20  ;;  %v44_v37 = vadd.f32 %v43_v32, %v42_v26 }
   0xf   :  { %v46_v33 = vmul.f32 0.2, %v23_v27  ;;  %v47_v36 = vmul.f32 0.2, %v30_v31 }
  0x10   :  { %v48_v34 = vmul.f32 0.2, %v37_v28  ;;  %v49_v42 = vmul.f32 0.2, %v44_v37 }
  0x11   :  { %v70_v38 = vsub.f32 %v9_v29, %v46_v33  ;;  %v71_v41 = vsub.f32 %v11_v35, %v47_v36  ;;  %v51_v45 = vsub.f32 %v10_v4, %v47_v36  ;;  %v50_v55 = vsub.f32 %v8_v0, %v46_v33 }
  0x12   :  { %v72_v39 = vsub.f32 %v13_v30, %v48_v34  ;;  %v73_v47 = vsub.f32 %v15_v40, %v49_v42  ;;  %v52_v58 = vsub.f32 %v12_v1, %v48_v34  ;;  %v53_v61 = vsub.f32 %v14_v9, %v49_v42 }
  0x13   :  { %v74_v43 = vmul.f32 %v70_v38, %v70_v38  ;;  %v75_v46 = vmul.f32 %v71_v41, %v71_v41  ;;  %v55_v52 = vmul.f32 %v51_v45, %v51_v45  ;;  %v54_v56 = vmul.f32 %v50_v55, %v50_v55 }
  0x14   :  { %v76_v44 = vmul.f32 %v72_v39, %v72_v39  ;;  %v77_v50 = vmul.f32 %v73_v47, %v73_v47  ;;  %v56_v59 = vmul.f32 %v52_v58, %v52_v58  ;;  %v57_v62 = vmul.f32 %v53_v61, %v53_v61 }
  0x15   :  { %v78_v48 = vsel %vm16_vm0, %v74_v43, 0.0  ;;  %v81_v51 = vsel %vm16_vm0, %v75_v46, 0.0  ;;  %v61_v54 = vsel %vm16_vm0, %v55_v52, 0.0  ;;  %v58_v57 = vsel %vm16_vm0, %v54_v56, 0.0 }
  0x16   :  { %v84_v49 = vsel %vm16_vm0, %v76_v44, 0.0  ;;  %79 = vadd.xlane.f32.xlu0 %v78_v48  ;;  %v87_v53 = vsel %vm16_vm0, %v77_v50, 0.0  ;;  %v64_v60 = vsel %vm16_vm0, %v56_v59, 0.0  ;;  %v67_v63 = vsel %vm16_vm0, %v57_v62, 0.0 }
  0x17   :  { %85 = vadd.xlane.f32.xlu1 %v84_v49  ;;  %v300_v4 = vshrl.u32 %v94_v2, 7 }
  0x19   :  { %v303_v0 = vsub.s32 %v95_v3, %v300_v4  ;;  %v165_v36 = vsub.s32 1, %v300_v4  ;;  %v161_v37 = vsub.s32 0, %v300_v4  ;;  %v169_v38 = vsub.s32 2, %v300_v4 }
  0x1a   :  { %82 = vadd.xlane.f32.xlu0 %v81_v51  ;;  %v173_v40 = vsub.s32 3, %v300_v4 }
  0x1b   :  { %88 = vadd.xlane.f32.xlu1 %v87_v53 }
  0x1e   :  { %62 = vadd.xlane.f32.xlu0 %v61_v54 }
  0x1f   :  { %59 = vadd.xlane.f32.xlu1 %v58_v57 }
  0x23   :  { %65 = vadd.xlane.f32.xlu1 %v64_v60 }
  0xa3   :  { %v80_v5 = vpop.xlane.xlu0 %79 }
  0xa4   :  { %v86_v6 = vpop.xlane.xlu1 %85  ;;  %v99_v8 = vrot.slane %v80_v5, %v303_v0 }
  0xa5   :  { %v107_v11 = vrot.slane %v86_v6, %v303_v0 }
  0xa7   :  { %v83_v1 = vpop.xlane.xlu0 %82 }
  0xa8   :  { %v89_v7 = vpop.xlane.xlu1 %88  ;;  %v103_v10 = vrot.slane %v83_v1, %v303_v0 }
  0xa9   :  { %v111_v9 = vrot.slane %v89_v7, %v303_v0 }
  0xaa   :  { %v113_v12 = vsel %vm112_vm1, %v103_v10, %v99_v8 }
  0xab   :  { %v115_v13 = vsel %vm114_vm2, %v107_v11, %v113_v12  ;;  %v63_v18 = vpop.xlane.xlu0 %62 }
  0xac   :  { %v117_v14 = vsel %vm116_vm3, %v111_v9, %v115_v13  ;;  %v60_v17 = vpop.xlane.xlu1 %59  ;;  %243 = vrsqrt.f32 %v63_v18  ;;  %vm139_vm5 = vcmp.eq.f32.partialorder %v63_v18, inf  ;;  %v142_v28 = vand.u32 2147483648, %v63_v18 }
  0xad   :  { %v120_v15 = vsel %vm119_vm4, %v117_v14, inf  ;;  %245 = vrsqrt.f32 %v60_v17  ;;  %vm132_vm6 = vcmp.eq.f32.partialorder %v60_v17, inf  ;;  %vm141_vm8 = vcmp.eq.f32.partialorder %v63_v18, 0.0 }
  0xae   :  { %121 = vmin.xlane.f32.xlu0 %v120_v15  ;;  %v135_v31 = vand.u32 2147483648, %v60_v17  ;;  %vm134_vm9 = vcmp.eq.f32.partialorder %v60_v17, 0.0 }
  0xb0   :  { %v66_v19 = vpop.xlane.xlu1 %65 }
  0xb1   :  { %247 = vrsqrt.f32 %v66_v19  ;;  %vm146_vm7 = vcmp.eq.f32.partialorder %v66_v19, inf  ;;  %vm148_vm10 = vcmp.eq.f32.partialorder %v66_v19, 0.0  ;;  %v149_v34 = vand.u32 2147483648, %v66_v19 }
  0xb2   :  { %68 = vadd.xlane.f32.xlu0 %v67_v63 }
  0xb6   :  { %v244_v21 = vpop.eup %243 }
  0xb7   :  { %v246_v22 = vpop.eup %245  ;;  %v138_v25 = vmul.f32 %v244_v21, %v63_v18 }
  0xb8   :  { %v131_v26 = vmul.f32 %v246_v22, %v60_v17 }
  0xb9   :  { %v140_v29 = vsel %vm139_vm5, %v63_v18, %v138_v25 }
  0xba   :  { %v133_v30 = vsel %vm132_vm6, %v60_v17, %v131_v26  ;;  %v143_v44 = vsel %vm141_vm8, %v142_v28, %v140_v29 }
  0xbb   :  { %v248_v23 = vpop.eup %247  ;;  %v136_v45 = vsel %vm134_vm9, %v135_v31, %v133_v30 }
  0xbc   :  { %v145_v27 = vmul.f32 %v248_v23, %v66_v19 }
  0xbe   :  { %v147_v33 = vsel %vm146_vm7, %v66_v19, %v145_v27 }
  0xbf   :  { %v150_v46 = vsel %vm148_vm10, %v149_v34, %v147_v33 }
 0x13b   :  { %v122_v20 = vpop.xlane.xlu0 %121 }
 0x13c   :  { %249 = vrsqrt.f32 %v122_v20  ;;  %vm125_vm11 = vcmp.eq.f32.partialorder %v122_v20, inf  ;;  %v128_v39 = vand.u32 2147483648, %v122_v20  ;;  %vm127_vm12 = vcmp.eq.f32.partialorder %v122_v20, 0.0 }
 0x13f   :  { %v69_v24 = vpop.xlane.xlu0 %68 }
 0x140   :  { %251 = vrsqrt.f32 %v69_v24  ;;  %vm153_vm13 = vcmp.eq.f32.partialorder %v69_v24, inf  ;;  %vm155_vm14 = vcmp.eq.f32.partialorder %v69_v24, 0.0  ;;  %v156_v51 = vand.u32 2147483648, %v69_v24 }
 0x146   :  { %v250_v32 = vpop.eup %249 }
 0x147   :  { %v124_v35 = vmul.f32 %v250_v32, %v122_v20 }
 0x149   :  { %v126_v41 = vsel %vm125_vm11, %v122_v20, %v124_v35 }
 0x14a   :  { %v252_v42 = vpop.eup %251  ;;  %v129_v43 = vsel %vm127_vm12, %v128_v39, %v126_v41 }
 0x14b   :  { %v152_v47 = vmul.f32 %v252_v42, %v69_v24  ;;  %v166_v48 = vrot.slane %v129_v43, %v165_v36  ;;  %v162_v49 = vrot.slane %v129_v43, %v161_v37  ;;  %v170_v50 = vrot.slane %v129_v43, %v169_v38 }
 0x14c   :  { %v174_v52 = vrot.slane %v129_v43, %v173_v40 }
 0x14d   :  { %v180_v53 = vsub.f32 %v143_v44, %v166_v48  ;;  %v179_v54 = vsub.f32 %v136_v45, %v162_v49  ;;  %v181_v55 = vsub.f32 %v150_v46, %v170_v50  ;;  %v154_v56 = vsel %vm153_vm13, %v69_v24, %v152_v47 }
 0x14e   :  { %v157_v57 = vsel %vm155_vm14, %v156_v51, %v154_v56 }
 0x14f   :  { %v184_v58 = vadd.f32 2.0, %v180_v53  ;;  %v183_v59 = vadd.f32 2.0, %v179_v54  ;;  %v185_v60 = vadd.f32 2.0, %v181_v55  ;;  %v182_v61 = vsub.f32 %v157_v57, %v174_v52 }
 0x151   :  { %v188_v62 = vmax.f32 %v184_v58, 0.0  ;;  %v187_v63 = vmax.f32 %v183_v59, 0.0  ;;  %v189_v4 = vmax.f32 %v185_v60, 0.0  ;;  %v186_v5 = vadd.f32 2.0, %v182_v61 }
 0x153   :  { %v192_v2 = vmul.f32 %v188_v62, %v188_v62  ;;  %v191_v3 = vmul.f32 %v187_v63, %v187_v63  ;;  %v193_v6 = vmul.f32 %v189_v4, %v189_v4  ;;  %v190_v1 = vmax.f32 %v186_v5, 0.0 }
 0x155   :  { %203 = vperm.xlu0 %242, %v192_v2   ;;  %200 = vperm.xlu1 %241, %v191_v3   ;;  %v194_v7 = vmul.f32 %v190_v1, %v190_v1 }
 0x159   :  { %206 = vperm.xlu1 %241, %v193_v6  }
 0x15d   :  { %209 = vperm.xlu1 %241, %v194_v7  }
 0x1d4   :  { %v201_v8 = vpop.permute.xlu1 %200  ;;  %v204_v10 = vpop.permute.xlu0 %203 }
 0x1d5   :  { %v218_v11 = vrot.slane %v204_v10, %v303_v0  ;;  %v214_v12 = vrot.slane %v201_v8, %v303_v0 }
 0x1d7   :  { %v227_v15 = vsel %vm112_vm1, %v218_v11, %v214_v12 }
 0x1d8   :  { %v207_v9 = vpop.permute.xlu1 %206 }
 0x1d9   :  { %v222_v13 = vrot.slane %v207_v9, %v303_v0 }
 0x1db   :  { %v228_v17 = vsel %vm114_vm2, %v222_v13, %v227_v15 }
 0x1dc   :  { %v210_v14 = vpop.permute.xlu1 %209 }
 0x1dd   :  { %v226_v16 = vrot.slane %v210_v14, %v303_v0 }
 0x1df   :  { %v229_v18 = vsel %vm116_vm3, %v226_v16, %v228_v17 }
 0x1e0   :  { %v231_v19 = vsel %vm119_vm4, %v229_v18, 0.0 }
 0x1e1   :  { %232 = vadd.xlane.f32.xlu1 %v231_v19 }
 0x26e   :  { %v233_v20 = vpop.xlane.xlu1 %232 }
 0x26f   :  { %235 = vst.msk [vmem:[%s331_s1] sm:$0xf] %vm234_vm15, %v233_v20 }

</bundles_post_ra>
